<compile_context>
chip_gen: v6e
topology: v6e:2x2x1
jax: 0.10.0
libtpu: 0.0.40
codegen_flags: <defaults>
</compile_context>

<pallas_src>
import functools

import jax
import jax.numpy as jnp
from jax.experimental import pallas as pl
from jax.experimental.pallas import tpu as pltpu


def _layernorm_kernel(x_ref, gamma_ref, beta_ref, o_ref, *, eps):
    # x_ref: (block_rows, hidden) in VMEM; gamma/beta: (1, hidden).
    # Row-wise LayerNorm: OOB rows of a ragged tail block are computed but
    # their stores are dropped by Pallas, so no masking is needed.
    x = x_ref[...].astype(jnp.float32)

    u = jnp.mean(x, axis=-1, keepdims=True)
    xc = x - u
    s = jnp.mean(xc * xc, axis=-1, keepdims=True)
    y = xc * jax.lax.rsqrt(s + eps)

    g = gamma_ref[...].astype(jnp.float32)
    b = beta_ref[...].astype(jnp.float32)
    o_ref[...] = (g * y + b).astype(o_ref.dtype)


def _round_up(x, m):
    return ((x + m - 1) // m) * m


def _sublane_multiple(itemsize):
    # Sub-32-bit dtypes pack along sublanes: f32 -> 8, bf16 -> 16, int8/fp8 -> 32.
    return max(8, 32 // max(1, itemsize))


def _vmem_capacity_bytes():
    """Physical VMEM for this generation; fall back to the smallest (v7x, 64 MiB)."""
    try:
        cap = int(pltpu.get_tpu_info().vmem_capacity_bytes)
        if cap > 0:
            return cap
    except Exception:
        pass
    return 64 * 1024 * 1024


def _working_set_bytes(block_rows, hidden, itemsize_in, itemsize_out):
    # Per grid step: double-buffered input block + double-buffered output block
    # + two f32 temporaries of the block (upcast + centered values).
    blk_in = block_rows * hidden * itemsize_in
    blk_out = block_rows * hidden * itemsize_out
    return 2 * blk_in + 2 * blk_out + 2 * block_rows * hidden * 4


def _choose_block_rows(rows, hidden, itemsize_in, itemsize_out, sublane,
                       target_rows=4096, vmem_budget=40 * 1024 * 1024,
                       min_grid_steps=4):
    """Largest sublane-multiple row tile fitting the VMEM budget.

    Also keeps at least `min_grid_steps` grid steps (when the problem is big
    enough) so v7x's two TensorCores each get >= 2 steps and DMA overlaps.
    """
    br = _round_up(min(target_rows, _round_up(rows, sublane)), sublane)
    while br > sublane and _working_set_bytes(
            br, hidden, itemsize_in, itemsize_out) > vmem_budget:
        br = _round_up(br // 2, sublane)
    while br > sublane and rows > sublane and pl.cdiv(rows, br) < min_grid_steps:
        br = _round_up(br // 2, sublane)
    return max(br, sublane)


def bert_layer_norm(x, gamma, beta, eps=1e-12, block_rows=None):
    """x: [..., hidden]; gamma, beta: [hidden]."""
    orig_shape = x.shape
    hidden = orig_shape[-1]
    rows = 1
    for d in orig_shape[:-1]:
        rows *= d

    x2 = x.reshape(rows, hidden)
    gamma2 = gamma.reshape(1, hidden)
    beta2 = beta.reshape(1, hidden)

    itemsize = jnp.dtype(x.dtype).itemsize
    sublane = _sublane_multiple(itemsize)

    # Generation-aware VMEM budgets: ~5/8 of physical for tile sizing,
    # ~3/4 of physical as the scoped-VMEM cap.
    vmem_cap = _vmem_capacity_bytes()
    vmem_budget = (vmem_cap * 5) // 8          # 128 MiB -> 80 MiB, 64 MiB -> 40 MiB
    vmem_limit_cap = (vmem_cap * 3) // 4       # 128 MiB -> 96 MiB, 64 MiB -> 48 MiB

    if block_rows is None:
        block_rows = _choose_block_rows(rows, hidden, itemsize, itemsize,
                                        sublane, vmem_budget=vmem_budget)
    else:
        block_rows = max(sublane, _round_up(block_rows, sublane))

    working = _working_set_bytes(block_rows, hidden, itemsize, itemsize)
    vmem_limit = int(min(vmem_limit_cap,
                         max(16 * 1024 * 1024, working + (4 << 20))))

    grid = (pl.cdiv(rows, block_rows),)

    kernel = functools.partial(_layernorm_kernel, eps=eps)

    out = pl.pallas_call(
        kernel,
        out_shape=jax.ShapeDtypeStruct((rows, hidden), x.dtype),
        grid_spec=pltpu.PrefetchScalarGridSpec(
            num_scalar_prefetch=0,
            grid=grid,
            in_specs=[
                pl.BlockSpec((block_rows, hidden), lambda i: (i, 0)),
                pl.BlockSpec((1, hidden), lambda i: (0, 0)),
                pl.BlockSpec((1, hidden), lambda i: (0, 0)),
            ],
            out_specs=pl.BlockSpec((block_rows, hidden), lambda i: (i, 0)),
        ),
        compiler_params=pltpu.CompilerParams(
            dimension_semantics=("parallel",),
            vmem_limit_bytes=vmem_limit,
        ),
    )(x2, gamma2, beta2)

    return out.reshape(orig_shape)


def _reference(x, gamma, beta, eps=1e-12):
    u = jnp.mean(x, axis=-1, keepdims=True)
    s = jnp.mean((x - u) ** 2, axis=-1, keepdims=True)
    return gamma * ((x - u) / jnp.sqrt(s + eps)) + beta


if __name__ == "__main__":
    key = jax.random.PRNGKey(0)
    batch, seq, hidden = 2, 8, 32  # small shapes consistent with BERT-style input

    x = jax.random.normal(key, (batch, seq, hidden), dtype=jnp.float32)
    # Deterministic params matching nn.Parameter(torch.ones/zeros(hidden))
    gamma = jnp.ones((hidden,), dtype=jnp.float32)
    beta = jnp.zeros((hidden,), dtype=jnp.float32)

    y = bert_layer_norm(x, gamma, beta)
    y = jax.block_until_ready(y)
    assert jnp.allclose(y, _reference(x, gamma, beta), atol=1e-5, rtol=1e-5), \
        "mismatch vs reference (even rows)"

    # Uneven-row case exercises the unmasked ragged-tail path (OOB rows dropped).
    x2 = jax.random.normal(jax.random.PRNGKey(1), (3, 5, hidden), dtype=jnp.float32)
    y2 = bert_layer_norm(x2, gamma, beta)
    y2 = jax.block_until_ready(y2)
    assert jnp.allclose(y2, _reference(x2, gamma, beta), atol=1e-5, rtol=1e-5), \
        "mismatch vs reference (ragged rows)"
    assert jnp.all(jnp.isfinite(y2)), "non-finite values in output"

    print("KERNEL_OK")
</pallas_src>

<mosaic_0001>
module attributes {stable_mosaic.version = 11 : i64} {
  func.func @_layernorm_kernel(%arg0: i32, %arg1: memref<8x32xf32, #tpu.memory_space<vmem>>, %arg2: memref<1x32xf32, #tpu.memory_space<vmem>>, %arg3: memref<1x32xf32, #tpu.memory_space<vmem>>, %arg4: memref<8x32xf32, #tpu.memory_space<vmem>>) attributes {dimension_semantics = [#tpu.dimension_semantics<parallel>], iteration_bounds = array<i64: 2>, scalar_prefetch = 0 : i64, scratch_operands = 0 : i64, tpu.core_type = #tpu.core_type<tc>, window_params = [{transform_indices = @transform_0, window_bounds = array<i64: 8, 32>}, {pipeline_mode = #tpu.pipeline_mode<synchronous>, transform_indices = @transform_1, window_bounds = array<i64: 1, 32>}, {pipeline_mode = #tpu.pipeline_mode<synchronous>, transform_indices = @transform_2, window_bounds = array<i64: 1, 32>}, {transform_indices = @transform_3, window_bounds = array<i64: 8, 32>}]} {
    %c0 = arith.constant 0 : index
    %c0_0 = arith.constant 0 : index
    %0 = vector.load %arg1[%c0, %c0_0] : memref<8x32xf32, #tpu.memory_space<vmem>>, vector<8x32xf32>
    %cst = arith.constant dense<0.000000e+00> : vector<8xf32>
    %1 = vector.multi_reduction <add>, %0, %cst [1] : vector<8x32xf32> to vector<8xf32>
    %2 = vector.shape_cast %1 : vector<8xf32> to vector<8x1xf32>
    %cst_1 = arith.constant 3.200000e+01 : f32
    %3 = vector.broadcast %cst_1 : f32 to vector<8x1xf32>
    %4 = arith.divf %2, %3 : vector<8x1xf32>
    %5 = vector.broadcast %4 : vector<8x1xf32> to vector<8x32xf32>
    %6 = arith.subf %0, %5 : vector<8x32xf32>
    %7 = arith.mulf %6, %6 : vector<8x32xf32>
    %cst_2 = arith.constant dense<0.000000e+00> : vector<8xf32>
    %8 = vector.multi_reduction <add>, %7, %cst_2 [1] : vector<8x32xf32> to vector<8xf32>
    %9 = vector.shape_cast %8 : vector<8xf32> to vector<8x1xf32>
    %cst_3 = arith.constant 3.200000e+01 : f32
    %10 = vector.broadcast %cst_3 : f32 to vector<8x1xf32>
    %11 = arith.divf %9, %10 : vector<8x1xf32>
    %cst_4 = arith.constant 9.99999996E-13 : f32
    %12 = vector.broadcast %cst_4 : f32 to vector<8x1xf32>
    %13 = arith.addf %11, %12 : vector<8x1xf32>
    %14 = math.rsqrt %13 : vector<8x1xf32>
    %15 = vector.broadcast %14 : vector<8x1xf32> to vector<8x32xf32>
    %16 = arith.mulf %6, %15 : vector<8x32xf32>
    %c0_5 = arith.constant 0 : index
    %c0_6 = arith.constant 0 : index
    %17 = vector.load %arg2[%c0_5, %c0_6] : memref<1x32xf32, #tpu.memory_space<vmem>>, vector<1x32xf32>
    %c0_7 = arith.constant 0 : index
    %c0_8 = arith.constant 0 : index
    %18 = vector.load %arg3[%c0_7, %c0_8] : memref<1x32xf32, #tpu.memory_space<vmem>>, vector<1x32xf32>
    %19 = vector.broadcast %17 : vector<1x32xf32> to vector<8x32xf32>
    %20 = arith.mulf %19, %16 : vector<8x32xf32>
    %21 = vector.broadcast %18 : vector<1x32xf32> to vector<8x32xf32>
    %22 = arith.addf %20, %21 : vector<8x32xf32>
    %c0_9 = arith.constant 0 : index
    %c0_10 = arith.constant 0 : index
    %23 = vector.load %arg4[%c0_9, %c0_10] : memref<8x32xf32, #tpu.memory_space<vmem>>, vector<8x32xf32>
    tpu.vector_store %arg4[%c0_9, %c0_10], %22 {strides = array<i32>} : memref<8x32xf32, #tpu.memory_space<vmem>>, vector<8x32xf32>,
    return
  }
  func.func @transform_0(%arg0: i32) -> (i32, i32) {
    %c0_i32 = arith.constant 0 : i32
    %c0_i32_0 = arith.constant 0 : i32
    return %arg0, %c0_i32 : i32, i32
  }
  func.func @transform_1(%arg0: i32) -> (i32, i32) {
    %c0_i32 = arith.constant 0 : i32
    %c0_i32_0 = arith.constant 0 : i32
    %c0_i32_1 = arith.constant 0 : i32
    return %c0_i32, %c0_i32_0 : i32, i32
  }
  func.func @transform_2(%arg0: i32) -> (i32, i32) {
    %c0_i32 = arith.constant 0 : i32
    %c0_i32_0 = arith.constant 0 : i32
    %c0_i32_1 = arith.constant 0 : i32
    return %c0_i32, %c0_i32_0 : i32, i32
  }
  func.func @transform_3(%arg0: i32) -> (i32, i32) {
    %c0_i32 = arith.constant 0 : i32
    %c0_i32_0 = arith.constant 0 : i32
    return %arg0, %c0_i32 : i32, i32
  }
}

</mosaic_0001>

<bundles_post_ra>
// kernel: tpu_custom_call.1
= control target key start
LH: loop header
LB: loop body
LE: loop exit
PB: predicated region body
PF: predicated region fallthrough
CT: control target
= control target key end

     0   :  { %8 = vsyncpa [#allocation3], 0  ;;  %s631_s0 = inlined_call_operand.hbm [shape: f32[16,32], index: 0, kind: input, shape index: {}]   ;;  %s632_s1 = inlined_call_operand.vmem [shape: f32[1,32], index: 1, kind: input, shape index: {}]   ;;  %s633_s2 = inlined_call_operand.vmem [shape: f32[1,32], index: 2, kind: input, shape index: {}]   ;;  %s634_s3 = inlined_call_operand.hbm [shape: f32[16,32], index: 3, kind: output, shape index: {}]  }
   0x1   :  { %10 = vsyncpa [#allocation3 + $0x1], 0 }
   0x2   :  { %11 = vsyncpa [#allocation4], 0 }
   0x3   :  { %13 = vsyncpa [#allocation4 + $0x1], 0  ;;  %s481_s12 = smov 0   ;;  %s483_s13 = smov 0  }
   0x4   :  { %s485_s14 = smov 0   ;;  %s487_s15 = smov 0  }
   0x5 LB: > { %s502_s16 = sadd.s32 4294967295, %s457_s15   ;;  %s303_s17 = sadd.s32 4294967294, %s457_s15   ;;  %s457_s15 = sphi %s487_s15, %s651_s15   ;;  %s453_s14 = sphi %s485_s14, %s650_s14   ;;  %s449_s13 = sphi %s483_s13, %s649_s13   ;;  %s445_s12 = sphi %s481_s12, %s648_s12  }
   0x6   : > { %s506_s18 = sadd.s32 1, %s457_s15   ;;  %s26_s19 = sadd.s32 1, %s453_s14 }
   0x7   : > { %s23_s20 = ssub.s32 %s457_s15, %s506_s18  ;;  %p33_p0 = scmp.ne.s32.totalorder %s453_s14, %s449_s13 }
   0x8   : > { %p24_p1 = scmp.eq.s32.totalorder %s23_s20, 0  ;;  %p34_p2 = scmp.eq.s32.totalorder %s457_s15, 0 }
   0x9   : > { %p39_p3 = scmp.ne.s32.totalorder %s449_s13, %s445_s12  ;;  %p40_p4 = scmp.eq.s32.totalorder %s502_s16, 0 }
   0xa   : > { %s518_s21 = scalar_select %p24_p1, %s453_s14, %s26_s19  }
   0xb   : > { %p520_p5 = por %p34_p2, %p33_p0  ;;  %p524_p6 = por %p40_p4, %p39_p3 }
   0xc   : > { %p105_p7 = scmp.eq.s32.totalorder %s502_s16, 1  ;;  %p111_p8 = scmp.eq.s32.totalorder %s303_s17, 1 }
   0xd   : > { %s638_s23 = scalar_select %p524_p6, 1, 0 }
   0xe   : > { %p329_p10 = scmp.lt.s32.totalorder %s457_s15, 2  ;;  %p531_p11 = por %p105_p7, %p33_p0 }
   0xf   : > { %p535_p12 = por %p111_p8, %p39_p3  ;;  %s137_s26 = sand.u32 1, %s453_s14  }
  0x10   : > { %s639_s24 = scalar_select %p531_p11, 1, 0 }
  0x11   : > { %s640_s25 = scalar_select %p535_p12, 1, 0 }
  0x12   : > { %s307_s27 = sshll.u32 %s457_s15, 7  ;;  %s306_s28 = sshll.u32 %s137_s26, 3 }
  0x13   : > { %s544_s4 = scalar_lea.hbm %s631_s0, %s307_s27  ;;  %s141_s5 = scalar_lea.vmem [#allocation2], %s306_s28 }
  0x14   : > { %s148_s6 = sshll.u32 %s141_s5, 4  ;;  %p548_p13 = pnand %p329_p10, %p520_p5  ;;  %s552_s6 = int_to_ptr.vmem [resolvable:$true] %s148_s6 }
  0x15   : > { %s138_s8 = scalar_lea.sflag [#allocation3], %s137_s26  ;;  %s365_s9 = scalar_lea.hbm %s544_s4, 128 }
  0x16   : > { %p366_p2 = scmp.ne.s32.totalorder %s544_s4, %s365_s9  ;;  %p367_p3 = pneg %p548_p13 }
  0x17   : > { %s370_s17 = scalar_lea.hbm %s631_s0, 256  ;;  %p371_p5 = scmp.lt.s32.totalorder %s544_s4, %s631_s0 }
  0x18   : > { %p368_p4 = pnand %p367_p3, %p366_p2  ;;  %p372_p8 = scmp.lt.s32.totalorder %s370_s17, %s365_s9 }
  0x1a   : > { %p369_p7 = pneg %p368_p4  ;;  %p373_p10 = por %p372_p8, %p371_p5 }
  0x1c   : > { %p374_p9 = pnand %p373_p10, %p369_p7 }
  0x1e   : > { %377 = shalt.err (!%p374_p9)
}
  0x1f   : > { %s378_s22 = scalar_lea.vmem %s552_s6, 128  ;;  %s459_s26 = smov [#allocation2]  }
  0x20   : > { %p379_p0 = scmp.ne.s32.totalorder %s552_s6, %s378_s22  ;;  %s383_s27 = sshll.u32 %s459_s26, 4  ;;  %s384_s27 = int_to_ptr.vmem [resolvable:$false] %s383_s27 }
  0x21   : > { %s385_s28 = scalar_lea.vmem %s384_s27, 256  ;;  %p386_p4 = scmp.lt.s32.totalorder %s552_s6, %s384_s27 }
  0x22   : > { %p381_p1 = pnand %p379_p0, %p367_p3  ;;  %p387_p12 = scmp.lt.s32.totalorder %s385_s28, %s378_s22 }
  0x24   : > { %p382_p2 = pneg %p381_p1  ;;  %p388_p11 = por %p387_p12, %p386_p4 }
  0x26   : > { %p389_p6 = pnand %p388_p11, %p382_p2 }
  0x28   : > { %392 = shalt.err (!%p389_p6)
}
  0x29   : > { %324 = dma.hbm_to_vmem [thread:$0]  (!%p548_p13), %s544_s4, 128, %s552_s6, %s138_s8  }
  0x2a   : > { %p642_p9 = scmp.lt.s32.totalorder %s457_s15, 3  ;;  %p643_p7 = scmp.ge.s32.totalorder %s457_s15, 1 }
  0x2c   : > { %p154_p0 = pnand %p643_p7, %p642_p9 }
  0x2d   : > { %s579_s29 = sand.u32 (!%p154_p0), 1, %s449_s13   ;;  %p644_p6 = scmp.ne.s32.totalorder (!%p154_p0), %s638_s23, 0 }
  0x2e   : > { %157 = sbr.rel (%p154_p0) target bundleno = 374 (0x176), region = 32  ;;  %s309_s30 = sshll.u32 (!%p154_p0), %s579_s29, 3 }
  0x2f   : > { %s160_s5 = scalar_lea.sflag (!%p154_p0), [#allocation3], %s579_s29  ;;  %s163_s9 = scalar_lea.vmem (!%p154_p0), [#allocation2], %s309_s30 }
  0x33   : > { %436 = dma.done.wait (%p644_p6), %s160_s5, 128  }
  0x34   : > { %438 = vsyncadd (%p644_p6), %s160_s5, 4294967168  ;;  %vm187_vm0 = vcmask 261120   ;;  %v186_v0 = vld [vmem:[%s163_s9] sm:$0xff]  ;;  %s314_s8 = sshll.u32 %s502_s16, 7  ;;  %s185_s10 = scalar_lea.vmem [#allocation5], %s309_s30 }
  0x35   : > { %v188_v1 = vsel %vm187_vm0, %v186_v0, 0.0  ;;  %v311_v11 = vld [vmem:[%s632_s1] ss:$0 sm:$0xff]  ;;  %s233_s11 = sshll.u32 %s185_s10, 4  ;;  %s231_s20 = scalar_lea.hbm %s634_s3, %s314_s8  ;;  %s234_s11 = int_to_ptr.vmem [resolvable:$true] %s233_s11 }
  0x36   : > { %189 = vadd.xlane.f32.xlu0 %v188_v1  ;;  %v312_v13 = vld [vmem:[%s633_s2] ss:$0 sm:$0xff]  ;;  %s220_s22 = scalar_lea.sflag [#allocation4], %s579_s29  ;;  %s393_s26 = scalar_lea.vmem %s234_s11, 128 }
  0x37   : > { %p394_p11 = scmp.ne.s32.totalorder %s234_s11, %s393_s26  ;;  %p645_p12 = scmp.ne.s32.totalorder %s639_s24, 0 }
  0x38   : > { %s460_s27 = smov [#allocation5]  }
  0x39   : > { %p395_p13 = pnand %p394_p11, %p645_p12  ;;  %s397_s28 = sshll.u32 %s460_s27, 4  ;;  %s398_s28 = int_to_ptr.vmem [resolvable:$false] %s397_s28 }
  0x3a   : > { %s399_s16 = scalar_lea.vmem %s398_s28, 256  ;;  %p400_p3 = scmp.lt.s32.totalorder %s234_s11, %s398_s28 }
  0x3b   : > { %p396_p1 = pneg %p395_p13  ;;  %p401_p5 = scmp.lt.s32.totalorder %s399_s16, %s393_s26 }
  0x3d   : > { %p402_p8 = por %p401_p5, %p400_p3 }
  0x3f   : > { %p403_p10 = pnand %p402_p8, %p396_p1 }
  0xbf   : > { %v190_v2 = vpop.xlane.xlu0 %189 }
  0xc0   : > { %v192_v3 = vmul.f32 0.03125, %v190_v2 }
  0xc2   : > { %v193_v4 = vsub.f32 %v186_v0, %v192_v3 }
  0xc4   : > { %v194_v5 = vmul.f32 %v193_v4, %v193_v4 }
  0xc6   : > { %v195_v6 = vsel %vm187_vm0, %v194_v5, 0.0 }
  0xc7   : > { %196 = vadd.xlane.f32.xlu0 %v195_v6 }
 0x150   : > { %v197_v7 = vpop.xlane.xlu0 %196 }
 0x151   : > { %v198_v8 = vmul.f32 0.03125, %v197_v7 }
 0x153   : > { %v199_v9 = vadd.f32 1e-12, %v198_v8 }
 0x155   : > { %363 = vrsqrt.f32 %v199_v9 }
 0x162   : > { %v364_v10 = vpop.eup %363 }
 0x163   : > { %v201_v12 = vmul.f32 %v364_v10, %v193_v4 }
 0x165   : > { %v210_v14 = vmul.f32 %v311_v11, %v201_v12 }
 0x167   : > { %v217_v15 = vadd.f32 %v312_v13, %v210_v14 }
 0x169   : > { %218 = vst.msk [vmem:[%s185_s10] sm:$0xff] %vm187_vm0, %v217_v15 }
 0x16a   : > { %406 = shalt.err (!%p403_p10)
}
 0x16b   : > { %s407_s30 = scalar_lea.hbm %s231_s20, 128  ;;  %s411_s9 = scalar_lea.hbm %s634_s3, 256 }
 0x16c   : > { %p408_p2 = scmp.ne.s32.totalorder %s231_s20, %s407_s30  ;;  %p412_p7 = scmp.lt.s32.totalorder %s231_s20, %s634_s3 }
 0x16d   : > { %p413_p0 = scmp.lt.s32.totalorder %s411_s9, %s407_s30 }
 0x16e   : > { %p409_p4 = pnand %p408_p2, %p645_p12 }
 0x16f   : > { %p414_p6 = por %p413_p0, %p412_p7 }
 0x170   : > { %p410_p9 = pneg %p409_p4 }
 0x172   : > { %p415_p11 = pnand %p414_p6, %p410_p9 }
 0x174   : > { %418 = shalt.err (!%p415_p11)
}
 0x175   : > { %319 = dma.vmem_to_hbm [thread:$0]  (%p645_p12), %s234_s11, 128, %s231_s20, %s220_s22  }
 0x176 PF: > { %s245_s6 = sand.u32 1, %s445_s12   ;;  %p646_p13 = scmp.ne.s32.totalorder %s640_s25, 0 }
 0x177   : > { %p647_p1 = scmp.ge.s32.totalorder %s457_s15, 2  ;;  %s246_s7 = scalar_lea.sflag [#allocation4], %s245_s6 }
 0x179   : > { %p326_p3 = pnand %p647_p1, %p646_p13 }
 0x17b   : > { %p327_p5 = pneg %p326_p3 }
 0x17d   : > { %440 = dma.done.wait (%p327_p5), %s246_s7, 128  }
 0x17e   : > { %442 = vsyncadd (%p327_p5), %s246_s7, 4294967168  ;;  %p16_p8 = scmp.ge.s32.totalorder %s506_s18, 4   ;;  %s648_s12 = smov %s449_s13 }
 0x17f   : > { %s649_s13 = smov %s453_s14  ;;  %s650_s14 = smov %s518_s21 }
 0x180   : > { %s651_s15 = smov %s506_s18  ;;  %18 = sbr.rel (!%p16_p8) target bundleno = 5 (0x5), region = 77 }
 0x185   :  { %251 = vsyncpa [#allocation3], 1 }
 0x186   :  { %253 = vsyncpa [#allocation3 + $0x1], 1 }
 0x187   :  { %254 = vsyncpa [#allocation4], 1 }
 0x188   :  { %256 = vsyncpa [#allocation4 + $0x1], 1 }

</bundles_post_ra>
